<compile_context>
chip_gen: v6e
topology: v6e:2x2x1
jax: 0.10.0
libtpu: 0.0.40
codegen_flags: <defaults>
</compile_context>

<pallas_src>
import math

import jax
import jax.numpy as jnp
from jax.experimental import pallas as pl
from jax.experimental.pallas import tpu as pltpu


def _shared_dropout_kernel(x_ref, m_ref, o_ref):
    # Pure-VPU elementwise: (tr, tc) activations times a (1, tc) mask broadcast
    # along the shared (sublane) axis.  Mask is already in x.dtype and
    # pre-scaled by 1/(1-r), so this is one vmul per vreg.
    o_ref[...] = x_ref[...] * m_ref[...]


def _round_up(a, b):
    return (a + b - 1) // b * b


def _choose_tiles(S, M, itemsize, target_bytes):
    """Pick (tr, tc) block dims: lane-dense last dim, dtype-aware sublane quantum."""
    sub_q = max(8, 32 // itemsize)          # 8 for f32, 16 for bf16, 32 for int8/fp8
    lane_q = 128
    m_pad = _round_up(M, lane_q)
    if sub_q * m_pad * itemsize <= target_bytes:
        # Full trailing width: one contiguous DMA per block, mask block reused.
        tc = M
        rows = (target_bytes // (m_pad * itemsize)) // sub_q * sub_q
        tr = S if rows >= S else max(sub_q, rows)
    else:
        tr = S if S < sub_q else sub_q
        cols = (target_bytes // (max(tr, 1) * itemsize)) // lane_q * lane_q
        tc = M if cols >= M else max(lane_q, cols)
    return tr, tc


def _fold_factor(S, M, lane_q=128):
    """Smallest k dividing S with k*M >= lane_q.  Folding k shared rows into the
    lane axis is exact because the mask is constant along the shared axis."""
    if M >= lane_q:
        return 1
    for k in range(1, S + 1):
        if S % k == 0 and k * M >= lane_q:
            return k
    return S


def shared_dropout(x, key, r, batch_dim, *, training=True,
                   target_block_bytes=2 * 1024 * 1024, donate=False):
    """Dropout with the mask shared along `batch_dim` (contiguous axis/axes)."""
    if not training or r == 0.0:
        return x                                        # identity in eval mode
    if r >= 1.0:
        return jnp.zeros_like(x)

    if isinstance(batch_dim, int):
        batch_dim = [batch_dim]
    bd = sorted(d % x.ndim for d in batch_dim)
    if any(b - a != 1 for a, b in zip(bd[:-1], bd[1:])):
        # TODO(synk): non-contiguous batch_dim sets need an axis permutation pass;
        # only contiguous shared axes (the AF2 row/column dropout case) are implemented.
        raise NotImplementedError("shared_dropout: batch_dim axes must be contiguous")
    sd0, sd1 = bd[0], bd[-1] + 1

    shape = x.shape
    lead = math.prod(shape[:sd0])
    S = math.prod(shape[sd0:sd1])                       # shared axis (mask constant)
    M = math.prod(shape[sd1:])                          # trailing (lane) axis

    # PyTorch reference: mask = nn.Dropout(r)(x.new_ones(mask_shape)), i.e.
    # Bernoulli(1-r) scaled by 1/(1-r), in x.dtype, shared along batch_dim.
    scale = 1.0 / (1.0 - r)
    keep = jax.random.bernoulli(key, p=1.0 - r, shape=(lead, 1, M))
    mask = (keep * jnp.float32(scale)).astype(x.dtype)

    # Lane-dense stores: if the trailing width is under one lane vector, fold
    # shared rows into the lane axis and replicate the mask along lanes.
    k = _fold_factor(S, M)
    if k > 1:
        S, M = S // k, k * M
        mask = jnp.tile(mask, (1, 1, k))

    x3 = x.reshape(lead, S, M)                          # pure view, no transpose
    itemsize = jnp.dtype(x.dtype).itemsize
    tr, tc = _choose_tiles(S, M, itemsize, target_block_bytes)
    grid = (lead, pl.cdiv(M, tc), pl.cdiv(S, tr))

    out3 = pl.pallas_call(
        _shared_dropout_kernel,
        out_shape=jax.ShapeDtypeStruct((lead, S, M), x.dtype),
        grid_spec=pltpu.PrefetchScalarGridSpec(
            num_scalar_prefetch=0,
            grid=grid,
            in_specs=[
                # Leading dim squeezed (None) -> kernel sees 2-D (tr, tc) refs.
                pl.BlockSpec((None, tr, tc), lambda b, ct, rt: (b, rt, ct)),
                pl.BlockSpec((None, 1, tc), lambda b, ct, rt: (b, 0, ct)),
            ],
            out_specs=pl.BlockSpec((None, tr, tc), lambda b, ct, rt: (b, rt, ct)),
        ),
        compiler_params=pltpu.CompilerParams(
            dimension_semantics=("parallel", "parallel", "parallel")),
        cost_estimate=pl.CostEstimate(
            flops=x.size, transcendentals=0,
            bytes_accessed=2 * x.size * itemsize + mask.size * itemsize),
        input_output_aliases=({0: 0} if donate else {}),
    )(x3, mask)
    return out3.reshape(shape)


def dropout_forward(x, key, r, batch_dim, *, training=True):
    """Mirrors Dropout.forward: accepts a single array or a list of arrays."""
    if isinstance(x, (list, tuple)):
        return [shared_dropout(xi, jax.random.fold_in(key, i), r, batch_dim,
                               training=training) for i, xi in enumerate(x)]
    return shared_dropout(x, key, r, batch_dim, training=training)


if __name__ == "__main__":
    # AlphaFold2-style row-wise shared dropout on a pair activation tensor.
    B, N, C = 2, 16, 32
    r = 0.25
    batch_dim = [1]                     # mask shared along axis 1

    key = jax.random.PRNGKey(0)
    kx, kmask, kextra = jax.random.split(key, 3)
    # Strictly-positive inputs keep the mask-recovery division well conditioned.
    x = jax.random.uniform(kx, (B, N, N, C), dtype=jnp.float32,
                           minval=0.5, maxval=1.5)

    out = shared_dropout(x, kmask, r, batch_dim, training=True)
    out = jax.block_until_ready(out)
    assert out.shape == x.shape and out.dtype == x.dtype

    # Eval mode is the identity.
    assert bool(jnp.array_equal(
        shared_dropout(x, kmask, r, batch_dim, training=False), x))

    # Structural checks (the torch RNG stream cannot be reproduced bitwise):
    scale = 1.0 / (1.0 - r)
    lead, S, M = B, N, N * C
    x3 = x.reshape(lead, S, M)
    o3 = jnp.asarray(out).reshape(lead, S, M)

    # 1) mask is shared along batch_dim: recover from row 0, check all rows.
    mask = o3[:, 0, :] / x3[:, 0, :]                    # (lead, M)
    assert bool(jnp.allclose(o3, x3 * mask[:, None, :], rtol=1e-5, atol=1e-6))
    # 2) mask values are exactly {0, 1/(1-r)}.
    assert bool(jnp.all(jnp.isclose(mask, 0.0, atol=1e-6) |
                        jnp.isclose(mask, scale, rtol=1e-5)))
    # 3) drop rate is in the right ballpark (1024 Bernoulli(0.25) draws).
    dropped = jnp.isclose(mask, 0.0, atol=1e-6)
    rate = float(jnp.mean(dropped))
    assert 0.05 < rate < 0.50, rate
    # 4) independent slices along non-shared axes get different masks.
    assert bool(jnp.any(dropped[0] != dropped[1]))

    # Small-trailing-width path (M < 128 -> lane fold): (2, 8, 64), batch_dim=[1].
    x_small = jax.random.uniform(kextra, (2, 8, 64), dtype=jnp.float32,
                                 minval=0.5, maxval=1.5)
    out_small = jax.block_until_ready(
        shared_dropout(x_small, jax.random.fold_in(kmask, 7), r, [1]))
    m_small = out_small[:, 0, :] / x_small[:, 0, :]
    assert bool(jnp.allclose(out_small, x_small * m_small[:, None, :],
                             rtol=1e-5, atol=1e-6))

    print("KERNEL_OK")
</pallas_src>

<mosaic_0001>
module attributes {stable_mosaic.version = 11 : i64} {
  func.func @_shared_dropout_kernel(%arg0: i32, %arg1: i32, %arg2: i32, %arg3: memref<1x16x512xf32, #tpu.memory_space<vmem>>, %arg4: memref<1x1x512xf32, #tpu.memory_space<vmem>>, %arg5: memref<1x16x512xf32, #tpu.memory_space<vmem>>) attributes {dimension_semantics = [#tpu.dimension_semantics<parallel>, #tpu.dimension_semantics<parallel>, #tpu.dimension_semantics<parallel>], iteration_bounds = array<i64: 2, 1, 1>, scalar_prefetch = 0 : i64, scratch_operands = 0 : i64, tpu.core_type = #tpu.core_type<tc>, window_params = [{transform_indices = @transform_0, window_bounds = array<i64: 1, 16, 512>}, {transform_indices = @transform_1, window_bounds = array<i64: 1, 1, 512>}, {transform_indices = @transform_2, window_bounds = array<i64: 1, 16, 512>}]} {
    %c0 = arith.constant 0 : index
    %c0_0 = arith.constant 0 : index
    %c0_1 = arith.constant 0 : index
    %0 = vector.load %arg3[%c0, %c0_0, %c0_1] : memref<1x16x512xf32, #tpu.memory_space<vmem>>, vector<1x16x512xf32>
    %1 = vector.shape_cast %0 : vector<1x16x512xf32> to vector<16x512xf32>
    %c0_2 = arith.constant 0 : index
    %c0_3 = arith.constant 0 : index
    %c0_4 = arith.constant 0 : index
    %2 = vector.load %arg4[%c0_2, %c0_3, %c0_4] : memref<1x1x512xf32, #tpu.memory_space<vmem>>, vector<1x1x512xf32>
    %3 = vector.shape_cast %2 : vector<1x1x512xf32> to vector<1x512xf32>
    %4 = vector.broadcast %3 : vector<1x512xf32> to vector<16x512xf32>
    %5 = arith.mulf %1, %4 : vector<16x512xf32>
    %c0_5 = arith.constant 0 : index
    %c0_6 = arith.constant 0 : index
    %c0_7 = arith.constant 0 : index
    %6 = vector.load %arg5[%c0_5, %c0_6, %c0_7] : memref<1x16x512xf32, #tpu.memory_space<vmem>>, vector<1x16x512xf32>
    %7 = vector.shape_cast %6 : vector<1x16x512xf32> to vector<16x512xf32>
    %8 = vector.shape_cast %5 : vector<16x512xf32> to vector<1x16x512xf32>
    tpu.vector_store %arg5[%c0_5, %c0_6, %c0_7], %8 {strides = array<i32>} : memref<1x16x512xf32, #tpu.memory_space<vmem>>, vector<1x16x512xf32>,
    return
  }
  func.func @transform_0(%arg0: i32, %arg1: i32, %arg2: i32) -> (i32, i32, i32) {
    %c0_i32 = arith.constant 0 : i32
    return %arg0, %arg2, %arg1 : i32, i32, i32
  }
  func.func @transform_1(%arg0: i32, %arg1: i32, %arg2: i32) -> (i32, i32, i32) {
    %c0_i32 = arith.constant 0 : i32
    %c0_i32_0 = arith.constant 0 : i32
    return %arg0, %c0_i32, %arg1 : i32, i32, i32
  }
  func.func @transform_2(%arg0: i32, %arg1: i32, %arg2: i32) -> (i32, i32, i32) {
    %c0_i32 = arith.constant 0 : i32
    return %arg0, %arg2, %arg1 : i32, i32, i32
  }
}

</mosaic_0001>

<bundles_post_ra>
// kernel: tpu_custom_call.1
= control target key start
LH: loop header
LB: loop body
LE: loop exit
PB: predicated region body
PF: predicated region fallthrough
CT: control target
= control target key end

     0   :  { %7 = vsyncpa [#allocation3], 0  ;;  %s870_s0 = inlined_call_operand.hbm [shape: f32[2,16,512], index: 0, kind: input, shape index: {}]   ;;  %s871_s1 = inlined_call_operand.hbm [shape: f32[2,1,512], index: 1, kind: input, shape index: {}]   ;;  %s872_s2 = inlined_call_operand.hbm [shape: f32[2,16,512], index: 2, kind: output, shape index: {}]  }
   0x1   :  { %9 = vsyncpa [#allocation3 + $0x1], 0 }
   0x2   :  { %10 = vsyncpa [#allocation6], 0 }
   0x3   :  { %12 = vsyncpa [#allocation6 + $0x1], 0 }
   0x4   :  { %13 = vsyncpa [#allocation4], 0 }
   0x5   :  { %15 = vsyncpa [#allocation4 + $0x1], 0  ;;  %s683_s9 = smov 0   ;;  %s685_s10 = smov 0  }
   0x6   :  { %s687_s11 = smov 0   ;;  %s689_s12 = smov 0  }
   0x7   :  { %s691_s13 = smov 0   ;;  %s693_s14 = smov 0  }
   0x8 LB: > { %s426_s15 = sadd.s32 4294967295, %s659_s14   ;;  %s427_s16 = sadd.s32 4294967294, %s659_s14   ;;  %s659_s14 = sphi %s693_s14, %s21_s14   ;;  %s655_s13 = sphi %s691_s13, %s883_s13   ;;  %s651_s12 = sphi %s689_s12, %s882_s12   ;;  %s647_s11 = sphi %s687_s11, %s881_s11   ;;  %s643_s10 = sphi %s685_s10, %s880_s10   ;;  %s639_s9 = sphi %s683_s9, %s879_s9  }
   0x9   : > { %s40_s17 = sadd.s32 1, %s655_s13  ;;  %s51_s18 = sadd.s32 1, %s647_s11 }
   0xa   : > { %p42_p0 = scmp.ge.s32.totalorder %s40_s17, 2  ;;  %p58_p1 = scmp.ne.s32.totalorder %s647_s11, %s643_s10 }
   0xb   : > { %p59_p2 = scmp.eq.s32.totalorder %s659_s14, 0  ;;  %p64_p3 = scmp.ne.s32.totalorder %s643_s10, %s639_s9 }
   0xc   : > { %s885_s17 = smov (%p42_p0, %s40_s17), 0  ;;  %p65_p5 = scmp.eq.s32.totalorder %s426_s15, 0 }
   0xd   : > { %p724_p4 = por %p59_p2, %p58_p1  ;;  %s44_s20 = ssub.s32 %s655_s13, %s885_s17 }
   0xe   : > { %p120_p6 = scmp.eq.s32.totalorder %s426_s15, 1  ;;  %p49_p7 = scmp.eq.s32.totalorder %s44_s20, 0 }
   0xf   : > { %p730_p8 = por %p65_p5, %p64_p3  ;;  %p126_p10 = scmp.eq.s32.totalorder %s427_s16, 1 }
  0x10   : > { %p734_p9 = por %p120_p6, %p58_p1  ;;  %p429_p12 = scmp.ge.s32.totalorder %s659_s14, 2 }
  0x11   : > { %s739_s23 = scalar_select %p49_p7, %s647_s11, %s51_s18  }
  0x12   : > { %p741_p11 = por %p126_p10, %p64_p3  ;;  %p465_p13 = scmp.lt.s32.totalorder %s659_s14, 2 }
  0x13   : > { %s748_s25 = sand.u32 1, %s647_s11   ;;  %s445_s27 = sshll.u32 %s655_s13, 10 }
  0x14   : > { %s430_s26 = sshll.u32 %s748_s25, 6  ;;  %s161_s30 = scalar_lea.hbm %s870_s0, %s445_s27 }
  0x15   : > { %s150_s3 = scalar_lea.vmem [#allocation2], %s430_s26  ;;  %p757_p0 = pnand %p465_p13, %p724_p4 }
  0x16   : > { %s162_s4 = sshll.u32 %s150_s3, 4  ;;  %p436_p1 = scmp.ge.s32.totalorder %s659_s14, 1  ;;  %s163_s4 = int_to_ptr.vmem [resolvable:$true] %s162_s4 }
  0x17   : > { %s147_s6 = scalar_lea.sflag [#allocation3], %s748_s25  ;;  %p521_p2 = pneg %p757_p0 }
  0x18   : > { %s532_s7 = scalar_lea.vmem %s163_s4, 1024  ;;  %s661_s8 = smov [#allocation2]  }
  0x19   : > { %p533_p3 = scmp.ne.s32.totalorder %s163_s4, %s532_s7  ;;  %s537_s15 = sshll.u32 %s661_s8, 4  ;;  %s538_s15 = int_to_ptr.vmem [resolvable:$false] %s537_s15 }
  0x1a   : > { %s539_s16 = scalar_lea.vmem %s538_s15, 2048  ;;  %p540_p4 = scmp.lt.s32.totalorder %s163_s4, %s538_s15 }
  0x1b   : > { %p535_p5 = pnand %p533_p3, %p521_p2  ;;  %p541_p7 = scmp.lt.s32.totalorder %s539_s16, %s532_s7 }
  0x1d   : > { %p536_p6 = pneg %p535_p5  ;;  %p542_p10 = por %p541_p7, %p540_p4 }
  0x1f   : > { %p543_p13 = pnand %p542_p10, %p536_p6 }
  0x21   : > { %546 = shalt.err (!%p543_p13)
}
  0x22   : > { %s662_s18 = smov 512   ;;  %s663_s19 = smov 32  }
  0x23   : > { %457 = dma.hbm_to_vmem [thread:$0]  (!%p757_p0), %s161_s30, 1024, %s163_s4, %s147_s6, %s662_s18, %s662_s18, %s663_s19  }
  0x24   : > { %p191_p3 = scmp.lt.s32.totalorder %s659_s14, 3  ;;  %s433_s20 = sshll.u32 %s748_s25, 2 }
  0x25   : > { %s446_s26 = sshll.u32 %s655_s13, 6  ;;  %s176_s7 = scalar_lea.vmem [#allocation5], %s433_s20 }
  0x26   : > { %p775_p5 = pnand %p436_p1, %p191_p3  ;;  %s184_s3 = scalar_lea.hbm %s871_s1, %s446_s26 }
  0x27   : > { %s186_s8 = sshll.u32 %s176_s7, 4  ;;  %s173_s15 = scalar_lea.sflag [#allocation6], %s748_s25  ;;  %s187_s8 = int_to_ptr.vmem [resolvable:$true] %s186_s8 }
  0x28   : > { %s560_s16 = scalar_lea.vmem %s187_s8, 64  ;;  %s664_s30 = smov [#allocation5]  }
  0x29   : > { %p561_p6 = scmp.ne.s32.totalorder %s187_s8, %s560_s16  ;;  %s565_s4 = sshll.u32 %s664_s30, 4  ;;  %s566_s4 = int_to_ptr.vmem [resolvable:$false] %s565_s4 }
  0x2a   : > { %s567_s6 = scalar_lea.vmem %s566_s4, 128  ;;  %p568_p1 = scmp.lt.s32.totalorder %s187_s8, %s566_s4 }
  0x2b   : > { %p563_p4 = pnand %p561_p6, %p521_p2  ;;  %p569_p10 = scmp.lt.s32.totalorder %s567_s6, %s560_s16 }
  0x2d   : > { %p564_p7 = pneg %p563_p4  ;;  %p570_p13 = por %p569_p10, %p568_p1 }
  0x2f   : > { %p571_p3 = pnand %p570_p13, %p564_p7 }
  0x31   : > { %574 = shalt.err (!%p571_p3)
}
  0x32   : > { %460 = dma.hbm_to_vmem [thread:$0]  (!%p757_p0), %s184_s3, 64, %s187_s8, %s173_s15  }
  0x33   : > { %195 = sbr.rel (%p775_p5) target bundleno = 87 (0x57), region = 28  ;;  %s791_s25 = sand.u32 (!%p775_p5), 1, %s643_s10  }
  0x34   : > { %s437_s18 = sshll.u32 (!%p775_p5), %s791_s25, 6  ;;  %s198_s19 = scalar_lea.sflag (!%p775_p5), [#allocation3], %s791_s25 }
  0x35   : > { %s201_s20 = scalar_lea.vmem (!%p775_p5), [#allocation2], %s437_s18 }
  0x38   : > { %626 = dma.done.wait (%p730_p8), %s198_s19, 1024  }
  0x39   : > { %628 = vsyncadd (%p730_p8), %s198_s19, 4294966272  ;;  %s438_s5 = sshll.u32 %s791_s25, 2  ;;  %s207_s26 = scalar_lea.sflag [#allocation6], %s791_s25 }
  0x3a   : > { %s210_s27 = scalar_lea.vmem [#allocation5], %s438_s5 }
  0x3b   : > { %630 = dma.done.wait (%p730_p8), %s207_s26, 64  }
  0x3c   : > { %632 = vsyncadd (%p730_p8), %s207_s26, 4294967232  ;;  %v251_v0 = vlaneseq  ;;  %v241_v6 = vld [vmem:[%s201_s20] sm:$0xff]  ;;  %s805_s28 = scalar_lea.vmem [#allocation7], %s437_s18  ;;  %v242_v8 = vld [vmem:[%s201_s20 + $0x8] sm:$0xff]  ;;  %s447_s3 = sshll.u32 %s651_s12, 10 }
  0x3d   : > { %v249_v7 = vld [vmem:[%s210_s27] sm:$0xf]  ;;  %s306_s29 = sshll.u32 %s805_s28, 4  ;;  %v243_v11 = vld [vmem:[%s201_s20 + $0x10] sm:$0xff]  ;;  %v244_v13 = vld [vmem:[%s201_s20 + $0x18] sm:$0xff]  ;;  %s814_s7 = scalar_lea.hbm %s872_s2, %s447_s3  ;;  %s809_s29 = int_to_ptr.vmem [resolvable:$true] %s306_s29 }
  0x3e   : > { %v252_v1 = vshrl.u32 %v251_v0, 7  ;;  %v245_v15 = vld [vmem:[%s201_s20 + $0x20] sm:$0xff]  ;;  %v246_v16 = vld [vmem:[%s201_s20 + $0x28] sm:$0xff]  ;;  %v247_v17 = vld [vmem:[%s201_s20 + $0x30] sm:$0xff]  ;;  %s288_s8 = scalar_lea.sflag [#allocation4], %s791_s25  ;;  %s575_s15 = scalar_lea.vmem %s809_s29, 1024 }
  0x3f   : > { %v248_v18 = vld [vmem:[%s201_s20 + $0x38] sm:$0xff]  ;;  %p576_p8 = scmp.ne.s32.totalorder %s809_s29, %s575_s15  ;;  %s665_s16 = smov [#allocation7]  }
  0x40   : > { %v253_v2 = vsub.s32 0, %v252_v1  ;;  %v257_v3 = vsub.s32 1, %v252_v1  ;;  %v261_v4 = vsub.s32 2, %v252_v1  ;;  %v265_v5 = vsub.s32 3, %v252_v1  ;;  %s579_s30 = sshll.u32 %s665_s16, 4  ;;  %s580_s30 = int_to_ptr.vmem [resolvable:$false] %s579_s30 }
  0x41   : > { %p577_p0 = pnand %p576_p8, %p734_p9  ;;  %s581_s4 = scalar_lea.vmem %s580_s30, 2048 }
  0x42   : > { %v254_v9 = vrot.slane %v249_v7, %v253_v2  ;;  %v258_v10 = vrot.slane %v249_v7, %v257_v3  ;;  %v262_v12 = vrot.slane %v249_v7, %v261_v4  ;;  %v266_v14 = vrot.slane %v249_v7, %v265_v5  ;;  %p582_p5 = scmp.lt.s32.totalorder %s809_s29, %s580_s30  ;;  %p583_p6 = scmp.lt.s32.totalorder %s581_s4, %s575_s15 }
  0x43   : > { %p578_p2 = pneg %p577_p0 }
  0x44   : > { %v271_v19 = vmul.f32 %v254_v9, %v241_v6  ;;  %v272_v20 = vmul.f32 %v258_v10, %v242_v8  ;;  %v273_v21 = vmul.f32 %v262_v12, %v243_v11  ;;  %v274_v22 = vmul.f32 %v266_v14, %v244_v13  ;;  %p584_p4 = por %p583_p6, %p582_p5 }
  0x45   : > { %v275_v23 = vmul.f32 %v254_v9, %v245_v15  ;;  %v276_v24 = vmul.f32 %v258_v10, %v246_v16  ;;  %v277_v25 = vmul.f32 %v262_v12, %v247_v17  ;;  %v278_v26 = vmul.f32 %v266_v14, %v248_v18 }
  0x46   : > { %279 = vst [vmem:[%s805_s28] sm:$0xff] %v271_v19  ;;  %280 = vst [vmem:[%s805_s28 + $0x8] sm:$0xff] %v272_v20  ;;  %p585_p7 = pnand %p584_p4, %p578_p2 }
  0x47   : > { %281 = vst [vmem:[%s805_s28 + $0x10] sm:$0xff] %v273_v21  ;;  %282 = vst [vmem:[%s805_s28 + $0x18] sm:$0xff] %v274_v22 }
  0x48   : > { %283 = vst [vmem:[%s805_s28 + $0x20] sm:$0xff] %v275_v23  ;;  %284 = vst [vmem:[%s805_s28 + $0x28] sm:$0xff] %v276_v24 }
  0x49   : > { %285 = vst [vmem:[%s805_s28 + $0x30] sm:$0xff] %v277_v25  ;;  %286 = vst [vmem:[%s805_s28 + $0x38] sm:$0xff] %v278_v26 }
  0x4a   : > { %588 = shalt.err (!%p585_p7)
}
  0x4b   : > { %s589_s6 = scalar_lea.hbm %s814_s7, 1024  ;;  %s593_s20 = scalar_lea.hbm %s872_s2, 2048 }
  0x4c   : > { %p590_p1 = scmp.ne.s32.totalorder %s814_s7, %s589_s6  ;;  %p594_p3 = scmp.lt.s32.totalorder %s814_s7, %s872_s2 }
  0x4d   : > { %p595_p8 = scmp.lt.s32.totalorder %s593_s20, %s589_s6 }
  0x4e   : > { %p591_p10 = pnand %p590_p1, %p734_p9 }
  0x4f   : > { %p596_p0 = por %p595_p8, %p594_p3 }
  0x50   : > { %p592_p13 = pneg %p591_p10 }
  0x52   : > { %p597_p2 = pnand %p596_p0, %p592_p13 }
  0x54   : > { %600 = shalt.err (!%p597_p2)
}
  0x55   : > { %s666_s27 = smov 512   ;;  %s667_s28 = smov 32  }
  0x56   : > { %452 = dma.vmem_to_hbm [thread:$0]  (%p734_p9), %s809_s29, 1024, %s814_s7, %s288_s8, %s666_s27, %s666_s27, %s667_s28  }
  0x57 PF: > { %s321_s3 = sand.u32 1, %s639_s9   ;;  %p462_p5 = pnand %p429_p12, %p741_p11 }
  0x58   : > { %s322_s12 = scalar_lea.sflag [#allocation4], %s321_s3 }
  0x59   : > { %p463_p6 = pneg %p462_p5 }
  0x5b   : > { %634 = dma.done.wait (%p463_p6), %s322_s12, 1024  }
  0x5c   : > { %636 = vsyncadd (%p463_p6), %s322_s12, 4294966272  ;;  %s21_s14 = sadd.s32 1, %s659_s14   ;;  %s879_s9 = smov %s643_s10 }
  0x5d   : > { %p18_p4 = scmp.ge.s32.totalorder %s21_s14, 4   ;;  %s880_s10 = smov %s647_s11 }
  0x5e   : > { %s881_s11 = smov %s739_s23  ;;  %s882_s12 = smov %s655_s13 }
  0x5f   : > { %s883_s13 = smov %s885_s17  ;;  %20 = sbr.rel (!%p18_p4) target bundleno = 8 (0x8), region = 86 }
  0x64   :  { %327 = vsyncpa [#allocation3], 1 }
  0x65   :  { %329 = vsyncpa [#allocation3 + $0x1], 1 }
  0x66   :  { %330 = vsyncpa [#allocation6], 1 }
  0x67   :  { %332 = vsyncpa [#allocation6 + $0x1], 1 }
  0x68   :  { %333 = vsyncpa [#allocation4], 1 }
  0x69   :  { %335 = vsyncpa [#allocation4 + $0x1], 1 }

</bundles_post_ra>
